<compile_context>
chip_gen: v7x
topology: tpu7x:2x2x1
jax: 0.10.0
libtpu: 0.0.40
codegen_flags: <defaults>
</compile_context>

<pallas_src>
import functools

import jax
import jax.numpy as jnp
import numpy as np
from jax.experimental import pallas as pl
from jax.experimental.pallas import tpu as pltpu

H = 64      # hidden_size
S = 8       # encoder sequence length
V = 256     # vocab size (embedding.num_embeddings)


def decoder_kernel(enc_ref, enc_t_ref, h0_ref, w_enc_ref, w_ph_ref,
                   w_i_ref, b_i_ref, w_h_ref, b_h_ref, w_out_ref, b_out_ref,
                   out_ref, h_scr):
    # Carry the hidden state in VMEM scratch across grid steps.
    @pl.when(pl.program_id(0) == 0)
    def _():
        h_scr[...] = h0_ref[...]

    h = h_scr[...]                                   # (1, H)
    enc = enc_ref[...]                               # (S, 2H)

    # --- attention scores (lane layout; MXU dot for the enc reduction) ---
    s1 = jnp.dot(w_enc_ref[...], enc_t_ref[...],
                 preferred_element_type=jnp.float32)                     # (1, S)
    s2 = jnp.sum(h * w_ph_ref[...], axis=1, keepdims=True)               # (1, 1)
    scores = s1 + s2                                                     # (1, S)
    # NOTE: b_enc + b_ph shift every score equally; Softmax(dim=0) is
    # shift-invariant, so they are omitted (exact).

    # --- softmax over the sequence positions ---
    m = jnp.max(scores, axis=1, keepdims=True)
    e = jnp.exp(scores - m)
    alpha = e * pl.reciprocal(jnp.sum(e, axis=1, keepdims=True))         # (1, S)

    # --- context = relu(alpha @ enc)  (MXU) ---
    context = jnp.maximum(
        jnp.dot(alpha, enc, preferred_element_type=jnp.float32), 0.0)    # (1, 2H)

    # --- GRU cell: two de-zeroed packed matmuls, gate order [r | z | n] ---
    gi = jnp.dot(context, w_i_ref[...],
                 preferred_element_type=jnp.float32) + b_i_ref[...]      # (1, 3H)
    gh = jnp.dot(h, w_h_ref[...],
                 preferred_element_type=jnp.float32) + b_h_ref[...]      # (1, 3H)
    r = jax.nn.sigmoid(gi[:, 0:H] + gh[:, 0:H])
    z = jax.nn.sigmoid(gi[:, H:2 * H] + gh[:, H:2 * H])
    n = jnp.tanh(gi[:, 2 * H:3 * H] + r * gh[:, 2 * H:3 * H])
    h_new = (1.0 - z) * n + z * h                                        # (1, H)
    h_scr[...] = h_new

    # --- output projection + log_softmax(dim=1) ---
    logits = jnp.dot(h_new, w_out_ref[...],
                     preferred_element_type=jnp.float32) + b_out_ref[...]  # (1, V)
    lm = jnp.max(logits, axis=1, keepdims=True)
    lse = jnp.log(jnp.sum(jnp.exp(logits - lm), axis=1, keepdims=True))
    logp = logits - lm - lse

    # --- ONE lane-dense store per step: [ logp (V) | h_new (H) | zero pad ] ---
    row = jnp.concatenate(
        [logp, h_new, jnp.zeros((1, 128 - H), jnp.float32)], axis=1)     # (1, V+128)
    out_ref[...] = row.reshape(1, 1, V + 128)


def pack_params(p):
    """One-time host-side packing of the module's weights for the kernel."""
    w_i = jnp.concatenate([p["w_ir"], p["w_iz"], p["w_in"]], axis=1)     # (2H, 3H)
    w_h = jnp.concatenate([p["w_hr"], p["w_hz"], p["w_hn"]], axis=1)     # (H, 3H)
    b_i = jnp.concatenate([p["b_ir"], p["b_iz"], p["b_in"]], axis=1)     # (1, 3H)
    b_h = jnp.concatenate([p["b_hr"], p["b_hz"], p["b_hn"]], axis=1)     # (1, 3H)
    # TODO(synk): for v5e, storing w_i/w_h/w_out in bf16 would halve the one-time
    # weight DMA; kept f32 here to preserve the 1e-4 tolerance against the reference.
    return {"w_att_enc": p["w_enc"],          # (1, 2H)
            "w_att_ph": p["w_ph"],            # (1, H)
            "w_i": w_i, "b_i": b_i, "w_h": w_h, "b_h": b_h,
            "w_out": p["w_out"], "b_out": p["b_out"]}


@functools.partial(jax.jit, static_argnames=("num_steps",))
def decoder_decode(encoder_output, previous_hidden_state, packed, num_steps=1):
    """Run `num_steps` decoder steps in ONE pallas_call (weights VMEM-resident,
    hidden state carried in scratch).  encoder_output: (1,S,2H); hidden: (1,1,H)."""
    enc = encoder_output.reshape(S, 2 * H)
    enc_t = enc.T                                    # tiny XLA transpose, done once
    h0 = previous_hidden_state.reshape(1, H)

    flops = num_steps * 2 * (2 * H * S + H + S * 2 * H
                             + 2 * H * 3 * H + H * 3 * H + H * V)
    trans = num_steps * (S + V + 3 * H + 4)
    bytes_acc = 4 * (2 * S * 2 * H + H + 2 * H + H
                     + 2 * H * 3 * H + H * 3 * H + 2 * 3 * H + H * V + V
                     + num_steps * (V + 128))

    slab = pl.pallas_call(
        decoder_kernel,
        out_shape=jax.ShapeDtypeStruct((num_steps, 1, V + 128), jnp.float32),
        grid=(num_steps,),
        in_specs=[
            pl.BlockSpec((S, 2 * H), lambda t: (0, 0)),       # enc
            pl.BlockSpec((2 * H, S), lambda t: (0, 0)),       # enc^T
            pl.BlockSpec((1, H), lambda t: (0, 0)),           # h0
            pl.BlockSpec((1, 2 * H), lambda t: (0, 0)),       # attention w_enc row
            pl.BlockSpec((1, H), lambda t: (0, 0)),           # attention w_ph row
            pl.BlockSpec((2 * H, 3 * H), lambda t: (0, 0)),   # GRU input weights packed
            pl.BlockSpec((1, 3 * H), lambda t: (0, 0)),       # GRU input bias packed
            pl.BlockSpec((H, 3 * H), lambda t: (0, 0)),       # GRU hidden weights packed
            pl.BlockSpec((1, 3 * H), lambda t: (0, 0)),       # GRU hidden bias packed
            pl.BlockSpec((H, V), lambda t: (0, 0)),           # output weight
            pl.BlockSpec((1, V), lambda t: (0, 0)),           # output bias
        ],
        out_specs=pl.BlockSpec((1, 1, V + 128), lambda t: (t, 0, 0)),
        scratch_shapes=[pltpu.VMEM((1, H), jnp.float32)],     # carried hidden state
        compiler_params=pltpu.CompilerParams(dimension_semantics=("arbitrary",)),
        cost_estimate=pl.CostEstimate(flops=flops, transcendentals=trans,
                                      bytes_accessed=bytes_acc),
    )(enc, enc_t, h0,
      packed["w_att_enc"], packed["w_att_ph"],
      packed["w_i"], packed["b_i"], packed["w_h"], packed["b_h"],
      packed["w_out"], packed["b_out"])

    logp = slab[:, 0, :V]                            # (num_steps, V)
    h_all = slab[:, 0, V:V + H]                      # (num_steps, H)
    return logp, h_all


def decoder_forward(encoder_output, word_input, previous_hidden_state, packed):
    """Single step, matching Decoder.forward exactly."""
    # TODO(synk): the reference forward embeds + dropouts word_input and then never
    # uses it; it cannot affect the outputs, so it is omitted here.
    del word_input
    logp, h_all = decoder_decode(encoder_output, previous_hidden_state, packed,
                                 num_steps=1)
    return logp, h_all.reshape(1, 1, H)


# ----------------------------- pure-JAX reference -----------------------------
def ref_forward(encoder_output, previous_hidden_state, p):
    enc = encoder_output.reshape(S, 2 * H)
    h = previous_hidden_state.reshape(1, H)
    s1 = enc @ p["w_enc"].T + p["b_enc"][0, 0]
    s2 = h @ p["w_ph"].T + p["b_ph"][0, 0]
    alpha = jax.nn.softmax(s1 + s2, axis=0)
    ctx = jnp.maximum(jnp.sum(enc * alpha, axis=0, keepdims=True), 0.0)
    r = jax.nn.sigmoid(ctx @ p["w_ir"] + p["b_ir"] + h @ p["w_hr"] + p["b_hr"])
    z = jax.nn.sigmoid(ctx @ p["w_iz"] + p["b_iz"] + h @ p["w_hz"] + p["b_hz"])
    n = jnp.tanh(ctx @ p["w_in"] + p["b_in"] + r * (h @ p["w_hn"] + p["b_hn"]))
    h_new = (1.0 - z) * n + z * h
    logits = h_new @ p["w_out"] + p["b_out"]
    return jax.nn.log_softmax(logits, axis=1), h_new.reshape(1, 1, H)


def ref_decode(encoder_output, previous_hidden_state, p, num_steps):
    h = previous_hidden_state
    logps, hs = [], []
    for _ in range(num_steps):
        lp, h = ref_forward(encoder_output, h, p)
        logps.append(lp)
        hs.append(h.reshape(1, H))
    return jnp.concatenate(logps, axis=0), jnp.concatenate(hs, axis=0)


def make_params(key):
    ks = jax.random.split(key, 20)
    sc = 0.1
    return {
        "w_enc": jax.random.normal(ks[1], (1, 2 * H), jnp.float32) * sc,
        "b_enc": jax.random.normal(ks[2], (1, 1), jnp.float32) * sc,
        "w_ph": jax.random.normal(ks[3], (1, H), jnp.float32) * sc,
        "b_ph": jax.random.normal(ks[4], (1, 1), jnp.float32) * sc,
        # GRU weights stored pre-transposed: input weights (2H, H), hidden weights (H, H)
        "w_ir": jax.random.normal(ks[5], (2 * H, H), jnp.float32) * sc,
        "w_iz": jax.random.normal(ks[6], (2 * H, H), jnp.float32) * sc,
        "w_in": jax.random.normal(ks[7], (2 * H, H), jnp.float32) * sc,
        "w_hr": jax.random.normal(ks[8], (H, H), jnp.float32) * sc,
        "w_hz": jax.random.normal(ks[9], (H, H), jnp.float32) * sc,
        "w_hn": jax.random.normal(ks[10], (H, H), jnp.float32) * sc,
        "b_ir": jax.random.normal(ks[11], (1, H), jnp.float32) * sc,
        "b_iz": jax.random.normal(ks[12], (1, H), jnp.float32) * sc,
        "b_in": jax.random.normal(ks[13], (1, H), jnp.float32) * sc,
        "b_hr": jax.random.normal(ks[14], (1, H), jnp.float32) * sc,
        "b_hz": jax.random.normal(ks[15], (1, H), jnp.float32) * sc,
        "b_hn": jax.random.normal(ks[16], (1, H), jnp.float32) * sc,
        # output Linear stored pre-transposed: (H, V)
        "w_out": jax.random.normal(ks[17], (H, V), jnp.float32) * sc,
        "b_out": jax.random.normal(ks[18], (1, V), jnp.float32) * sc,
    }


if __name__ == "__main__":
    key = jax.random.PRNGKey(0)
    kp, ke, kh = jax.random.split(key, 3)
    params = make_params(kp)
    packed = pack_params(params)             # one-time host-side packing

    encoder_output = jax.random.normal(ke, (1, S, 2 * H), jnp.float32)
    previous_hidden = jax.random.normal(kh, (1, 1, H), jnp.float32)
    word_input = jnp.array([3], dtype=jnp.int32)

    # --- single step (module forward semantics) ---
    logp, hidden = decoder_forward(encoder_output, word_input, previous_hidden, packed)
    jax.block_until_ready((logp, hidden))
    ref_logp, ref_hidden = ref_forward(encoder_output, previous_hidden, params)
    np.testing.assert_allclose(np.asarray(logp), np.asarray(ref_logp), rtol=1e-4, atol=1e-4)
    np.testing.assert_allclose(np.asarray(hidden), np.asarray(ref_hidden), rtol=1e-4, atol=1e-4)
    assert logp.shape == (1, V) and hidden.shape == (1, 1, H)

    # --- multi-step decode in ONE pallas_call (launch/weight-DMA amortization) ---
    T = 4
    logp_all, h_all = decoder_decode(encoder_output, previous_hidden, packed, num_steps=T)
    jax.block_until_ready((logp_all, h_all))
    ref_lp, ref_h = ref_decode(encoder_output, previous_hidden, params, T)
    np.testing.assert_allclose(np.asarray(logp_all), np.asarray(ref_lp), rtol=1e-4, atol=1e-4)
    np.testing.assert_allclose(np.asarray(h_all), np.asarray(ref_h), rtol=1e-4, atol=1e-4)

    print("KERNEL_OK")
</pallas_src>

<mosaic_0001>
module attributes {stable_mosaic.version = 11 : i64} {
  func.func @decoder_kernel(%arg0: i32, %arg1: memref<8x128xf32, #tpu.memory_space<vmem>>, %arg2: memref<128x8xf32, #tpu.memory_space<vmem>>, %arg3: memref<1x64xf32, #tpu.memory_space<vmem>>, %arg4: memref<1x128xf32, #tpu.memory_space<vmem>>, %arg5: memref<1x64xf32, #tpu.memory_space<vmem>>, %arg6: memref<128x192xf32, #tpu.memory_space<vmem>>, %arg7: memref<1x192xf32, #tpu.memory_space<vmem>>, %arg8: memref<64x192xf32, #tpu.memory_space<vmem>>, %arg9: memref<1x192xf32, #tpu.memory_space<vmem>>, %arg10: memref<64x256xf32, #tpu.memory_space<vmem>>, %arg11: memref<1x256xf32, #tpu.memory_space<vmem>>, %arg12: memref<1x1x384xf32, #tpu.memory_space<vmem>>, %arg13: memref<1x64xf32, #tpu.memory_space<vmem>>) attributes {dimension_semantics = [#tpu.dimension_semantics<arbitrary>], iteration_bounds = array<i64: 1>, scalar_prefetch = 0 : i64, scratch_operands = 1 : i64, tpu.core_type = #tpu.core_type<tc>, window_params = [{pipeline_mode = #tpu.pipeline_mode<synchronous>, transform_indices = @transform_0, window_bounds = array<i64: 8, 128>}, {pipeline_mode = #tpu.pipeline_mode<synchronous>, transform_indices = @transform_1, window_bounds = array<i64: 128, 8>}, {pipeline_mode = #tpu.pipeline_mode<synchronous>, transform_indices = @transform_2, window_bounds = array<i64: 1, 64>}, {pipeline_mode = #tpu.pipeline_mode<synchronous>, transform_indices = @transform_3, window_bounds = array<i64: 1, 128>}, {pipeline_mode = #tpu.pipeline_mode<synchronous>, transform_indices = @transform_4, window_bounds = array<i64: 1, 64>}, {pipeline_mode = #tpu.pipeline_mode<synchronous>, transform_indices = @transform_5, window_bounds = array<i64: 128, 192>}, {pipeline_mode = #tpu.pipeline_mode<synchronous>, transform_indices = @transform_6, window_bounds = array<i64: 1, 192>}, {pipeline_mode = #tpu.pipeline_mode<synchronous>, transform_indices = @transform_7, window_bounds = array<i64: 64, 192>}, {pipeline_mode = #tpu.pipeline_mode<synchronous>, transform_indices = @transform_8, window_bounds = array<i64: 1, 192>}, {pipeline_mode = #tpu.pipeline_mode<synchronous>, transform_indices = @transform_9, window_bounds = array<i64: 64, 256>}, {pipeline_mode = #tpu.pipeline_mode<synchronous>, transform_indices = @transform_10, window_bounds = array<i64: 1, 256>}, {transform_indices = @transform_11, window_bounds = array<i64: 1, 1, 384>}]} {
    %c0_i32 = arith.constant 0 : i32
    %0 = arith.cmpi eq, %arg0, %c0_i32 : i32
    %1 = arith.extui %0 : i1 to i32
    %c0_i32_0 = arith.constant 0 : i32
    %2 = arith.cmpi ne, %1, %c0_i32_0 : i32
    scf.if %2 {
      %c0_41 = arith.constant 0 : index
      %c0_42 = arith.constant 0 : index
      %82 = vector.load %arg3[%c0_41, %c0_42] : memref<1x64xf32, #tpu.memory_space<vmem>>, vector<1x64xf32>
      %c0_43 = arith.constant 0 : index
      %c0_44 = arith.constant 0 : index
      %83 = vector.load %arg13[%c0_43, %c0_44] : memref<1x64xf32, #tpu.memory_space<vmem>>, vector<1x64xf32>
      tpu.vector_store %arg13[%c0_43, %c0_44], %82 {strides = array<i32>} : memref<1x64xf32, #tpu.memory_space<vmem>>, vector<1x64xf32>,
    } else {
    }
    %c0 = arith.constant 0 : index
    %c0_1 = arith.constant 0 : index
    %3 = vector.load %arg13[%c0, %c0_1] : memref<1x64xf32, #tpu.memory_space<vmem>>, vector<1x64xf32>
    %c0_2 = arith.constant 0 : index
    %c0_3 = arith.constant 0 : index
    %4 = vector.load %arg1[%c0_2, %c0_3] : memref<8x128xf32, #tpu.memory_space<vmem>>, vector<8x128xf32>
    %c0_4 = arith.constant 0 : index
    %c0_5 = arith.constant 0 : index
    %5 = vector.load %arg4[%c0_4, %c0_5] : memref<1x128xf32, #tpu.memory_space<vmem>>, vector<1x128xf32>
    %c0_6 = arith.constant 0 : index
    %c0_7 = arith.constant 0 : index
    %6 = vector.load %arg2[%c0_6, %c0_7] : memref<128x8xf32, #tpu.memory_space<vmem>>, vector<128x8xf32>
    %cst = arith.constant dense<0.000000e+00> : vector<1x8xf32>
    %7 = tpu.matmul %5, %6, %cst {dimension_numbers = #tpu.dot_dimension_numbers<[1], [0], [0], [1], [0, 0, 1, 1], [], []>} : vector<1x128xf32>, vector<128x8xf32>, vector<1x8xf32> -> vector<1x8xf32>
    %c0_8 = arith.constant 0 : index
    %c0_9 = arith.constant 0 : index
    %8 = vector.load %arg5[%c0_8, %c0_9] : memref<1x64xf32, #tpu.memory_space<vmem>>, vector<1x64xf32>
    %9 = arith.mulf %3, %8 : vector<1x64xf32>
    %cst_10 = arith.constant dense<0.000000e+00> : vector<1xf32>
    %10 = vector.multi_reduction <add>, %9, %cst_10 [1] : vector<1x64xf32> to vector<1xf32>
    %11 = vector.shape_cast %10 : vector<1xf32> to vector<1x1xf32>
    %12 = vector.broadcast %11 : vector<1x1xf32> to vector<1x8xf32>
    %13 = arith.addf %7, %12 : vector<1x8xf32>
    %cst_11 = arith.constant dense<0xFF800000> : vector<1xf32>
    %14 = vector.multi_reduction <maximumf>, %13, %cst_11 [1] : vector<1x8xf32> to vector<1xf32>
    %15 = vector.shape_cast %14 : vector<1xf32> to vector<1x1xf32>
    %16 = vector.broadcast %15 : vector<1x1xf32> to vector<1x8xf32>
    %17 = arith.subf %13, %16 : vector<1x8xf32>
    %18 = math.exp %17 : vector<1x8xf32>
    %cst_12 = arith.constant dense<0.000000e+00> : vector<1xf32>
    %19 = vector.multi_reduction <add>, %18, %cst_12 [1] : vector<1x8xf32> to vector<1xf32>
    %20 = vector.shape_cast %19 : vector<1xf32> to vector<1x1xf32>
    %21 = tpu.reciprocal %20 : vector<1x1xf32> -> vector<1x1xf32>
    %22 = vector.broadcast %21 : vector<1x1xf32> to vector<1x8xf32>
    %23 = arith.mulf %18, %22 : vector<1x8xf32>
    %cst_13 = arith.constant dense<0.000000e+00> : vector<1x128xf32>
    %24 = tpu.matmul %23, %4, %cst_13 {dimension_numbers = #tpu.dot_dimension_numbers<[1], [0], [0], [1], [0, 0, 1, 1], [], []>} : vector<1x8xf32>, vector<8x128xf32>, vector<1x128xf32> -> vector<1x128xf32>
    %cst_14 = arith.constant 0.000000e+00 : f32
    %25 = vector.broadcast %cst_14 : f32 to vector<1x128xf32>
    %26 = arith.maximumf %24, %25 : vector<1x128xf32>
    %c0_15 = arith.constant 0 : index
    %c0_16 = arith.constant 0 : index
    %27 = vector.load %arg6[%c0_15, %c0_16] : memref<128x192xf32, #tpu.memory_space<vmem>>, vector<128x192xf32>
    %cst_17 = arith.constant dense<0.000000e+00> : vector<1x192xf32>
    %28 = tpu.matmul %26, %27, %cst_17 {dimension_numbers = #tpu.dot_dimension_numbers<[1], [0], [0], [1], [0, 0, 1, 1], [], []>} : vector<1x128xf32>, vector<128x192xf32>, vector<1x192xf32> -> vector<1x192xf32>
    %c0_18 = arith.constant 0 : index
    %c0_19 = arith.constant 0 : index
    %29 = vector.load %arg7[%c0_18, %c0_19] : memref<1x192xf32, #tpu.memory_space<vmem>>, vector<1x192xf32>
    %30 = arith.addf %28, %29 : vector<1x192xf32>
    %c0_20 = arith.constant 0 : index
    %c0_21 = arith.constant 0 : index
    %31 = vector.load %arg8[%c0_20, %c0_21] : memref<64x192xf32, #tpu.memory_space<vmem>>, vector<64x192xf32>
    %cst_22 = arith.constant dense<0.000000e+00> : vector<1x192xf32>
    %32 = tpu.matmul %3, %31, %cst_22 {dimension_numbers = #tpu.dot_dimension_numbers<[1], [0], [0], [1], [0, 0, 1, 1], [], []>} : vector<1x64xf32>, vector<64x192xf32>, vector<1x192xf32> -> vector<1x192xf32>
    %c0_23 = arith.constant 0 : index
    %c0_24 = arith.constant 0 : index
    %33 = vector.load %arg9[%c0_23, %c0_24] : memref<1x192xf32, #tpu.memory_space<vmem>>, vector<1x192xf32>
    %34 = arith.addf %32, %33 : vector<1x192xf32>
    %35 = vector.extract_strided_slice %30 {offsets = [0, 0], sizes = [1, 64], strides = [1, 1]} : vector<1x192xf32> to vector<1x64xf32>
    %36 = vector.extract_strided_slice %34 {offsets = [0, 0], sizes = [1, 64], strides = [1, 1]} : vector<1x192xf32> to vector<1x64xf32>
    %37 = arith.addf %35, %36 : vector<1x64xf32>
    %38 = arith.negf %37 : vector<1x64xf32>
    %39 = math.exp %38 : vector<1x64xf32>
    %cst_25 = arith.constant 1.000000e+00 : f32
    %40 = vector.broadcast %cst_25 : f32 to vector<1x64xf32>
    %41 = arith.addf %40, %39 : vector<1x64xf32>
    %42 = arith.divf %40, %41 : vector<1x64xf32>
    %43 = vector.extract_strided_slice %30 {offsets = [0, 64], sizes = [1, 64], strides = [1, 1]} : vector<1x192xf32> to vector<1x64xf32>
    %44 = vector.extract_strided_slice %34 {offsets = [0, 64], sizes = [1, 64], strides = [1, 1]} : vector<1x192xf32> to vector<1x64xf32>
    %45 = arith.addf %43, %44 : vector<1x64xf32>
    %46 = arith.negf %45 : vector<1x64xf32>
    %47 = math.exp %46 : vector<1x64xf32>
    %cst_26 = arith.constant 1.000000e+00 : f32
    %48 = vector.broadcast %cst_26 : f32 to vector<1x64xf32>
    %49 = arith.addf %48, %47 : vector<1x64xf32>
    %50 = arith.divf %48, %49 : vector<1x64xf32>
    %51 = vector.extract_strided_slice %30 {offsets = [0, 128], sizes = [1, 64], strides = [1, 1]} : vector<1x192xf32> to vector<1x64xf32>
    %52 = vector.extract_strided_slice %34 {offsets = [0, 128], sizes = [1, 64], strides = [1, 1]} : vector<1x192xf32> to vector<1x64xf32>
    %53 = arith.mulf %42, %52 : vector<1x64xf32>
    %54 = arith.addf %51, %53 : vector<1x64xf32>
    %55 = math.tanh %54 : vector<1x64xf32>
    %cst_27 = arith.constant 1.000000e+00 : f32
    %56 = vector.broadcast %cst_27 : f32 to vector<1x64xf32>
    %57 = arith.subf %56, %50 : vector<1x64xf32>
    %58 = arith.mulf %57, %55 : vector<1x64xf32>
    %59 = arith.mulf %50, %3 : vector<1x64xf32>
    %60 = arith.addf %58, %59 : vector<1x64xf32>
    %c0_28 = arith.constant 0 : index
    %c0_29 = arith.constant 0 : index
    %61 = vector.load %arg13[%c0_28, %c0_29] : memref<1x64xf32, #tpu.memory_space<vmem>>, vector<1x64xf32>
    tpu.vector_store %arg13[%c0_28, %c0_29], %60 {strides = array<i32>} : memref<1x64xf32, #tpu.memory_space<vmem>>, vector<1x64xf32>,
    %c0_30 = arith.constant 0 : index
    %c0_31 = arith.constant 0 : index
    %62 = vector.load %arg10[%c0_30, %c0_31] : memref<64x256xf32, #tpu.memory_space<vmem>>, vector<64x256xf32>
    %cst_32 = arith.constant dense<0.000000e+00> : vector<1x256xf32>
    %63 = tpu.matmul %60, %62, %cst_32 {dimension_numbers = #tpu.dot_dimension_numbers<[1], [0], [0], [1], [0, 0, 1, 1], [], []>} : vector<1x64xf32>, vector<64x256xf32>, vector<1x256xf32> -> vector<1x256xf32>
    %c0_33 = arith.constant 0 : index
    %c0_34 = arith.constant 0 : index
    %64 = vector.load %arg11[%c0_33, %c0_34] : memref<1x256xf32, #tpu.memory_space<vmem>>, vector<1x256xf32>
    %65 = arith.addf %63, %64 : vector<1x256xf32>
    %cst_35 = arith.constant dense<0xFF800000> : vector<1xf32>
    %66 = vector.multi_reduction <maximumf>, %65, %cst_35 [1] : vector<1x256xf32> to vector<1xf32>
    %67 = vector.shape_cast %66 : vector<1xf32> to vector<1x1xf32>
    %68 = vector.broadcast %67 : vector<1x1xf32> to vector<1x256xf32>
    %69 = arith.subf %65, %68 : vector<1x256xf32>
    %70 = math.exp %69 : vector<1x256xf32>
    %cst_36 = arith.constant dense<0.000000e+00> : vector<1xf32>
    %71 = vector.multi_reduction <add>, %70, %cst_36 [1] : vector<1x256xf32> to vector<1xf32>
    %72 = vector.shape_cast %71 : vector<1xf32> to vector<1x1xf32>
    %73 = math.log %72 : vector<1x1xf32>
    %74 = vector.broadcast %67 : vector<1x1xf32> to vector<1x256xf32>
    %75 = arith.subf %65, %74 : vector<1x256xf32>
    %76 = vector.broadcast %73 : vector<1x1xf32> to vector<1x256xf32>
    %77 = arith.subf %75, %76 : vector<1x256xf32>
    %cst_37 = arith.constant 0.000000e+00 : f32
    %78 = vector.broadcast %cst_37 : f32 to vector<1x64xf32>
    %79 = tpu.concatenate %77, %60, %78 in 1 : vector<1x256xf32>, vector<1x64xf32>, vector<1x64xf32> -> vector<1x384xf32>
    %80 = vector.shape_cast %79 : vector<1x384xf32> to vector<1x1x384xf32>
    %c0_38 = arith.constant 0 : index
    %c0_39 = arith.constant 0 : index
    %c0_40 = arith.constant 0 : index
    %81 = vector.load %arg12[%c0_38, %c0_39, %c0_40] : memref<1x1x384xf32, #tpu.memory_space<vmem>>, vector<1x1x384xf32>
    tpu.vector_store %arg12[%c0_38, %c0_39, %c0_40], %80 {strides = array<i32>} : memref<1x1x384xf32, #tpu.memory_space<vmem>>, vector<1x1x384xf32>,
    return
  }
  func.func @transform_0(%arg0: i32) -> (i32, i32) {
    %c0_i32 = arith.constant 0 : i32
    %c0_i32_0 = arith.constant 0 : i32
    %c0_i32_1 = arith.constant 0 : i32
    return %c0_i32, %c0_i32_0 : i32, i32
  }
  func.func @transform_1(%arg0: i32) -> (i32, i32) {
    %c0_i32 = arith.constant 0 : i32
    %c0_i32_0 = arith.constant 0 : i32
    %c0_i32_1 = arith.constant 0 : i32
    return %c0_i32, %c0_i32_0 : i32, i32
  }
  func.func @transform_2(%arg0: i32) -> (i32, i32) {
    %c0_i32 = arith.constant 0 : i32
    %c0_i32_0 = arith.constant 0 : i32
    %c0_i32_1 = arith.constant 0 : i32
    return %c0_i32, %c0_i32_0 : i32, i32
  }
  func.func @transform_3(%arg0: i32) -> (i32, i32) {
    %c0_i32 = arith.constant 0 : i32
    %c0_i32_0 = arith.constant 0 : i32
    %c0_i32_1 = arith.constant 0 : i32
    return %c0_i32, %c0_i32_0 : i32, i32
  }
  func.func @transform_4(%arg0: i32) -> (i32, i32) {
    %c0_i32 = arith.constant 0 : i32
    %c0_i32_0 = arith.constant 0 : i32
    %c0_i32_1 = arith.constant 0 : i32
    return %c0_i32, %c0_i32_0 : i32, i32
  }
  func.func @transform_5(%arg0: i32) -> (i32, i32) {
    %c0_i32 = arith.constant 0 : i32
    %c0_i32_0 = arith.constant 0 : i32
    %c0_i32_1 = arith.constant 0 : i32
    return %c0_i32, %c0_i32_0 : i32, i32
  }
  func.func @transform_6(%arg0: i32) -> (i32, i32) {
    %c0_i32 = arith.constant 0 : i32
    %c0_i32_0 = arith.constant 0 : i32
    %c0_i32_1 = arith.constant 0 : i32
    return %c0_i32, %c0_i32_0 : i32, i32
  }
  func.func @transform_7(%arg0: i32) -> (i32, i32) {
    %c0_i32 = arith.constant 0 : i32
    %c0_i32_0 = arith.constant 0 : i32
    %c0_i32_1 = arith.constant 0 : i32
    return %c0_i32, %c0_i32_0 : i32, i32
  }
  func.func @transform_8(%arg0: i32) -> (i32, i32) {
    %c0_i32 = arith.constant 0 : i32
    %c0_i32_0 = arith.constant 0 : i32
    %c0_i32_1 = arith.constant 0 : i32
    return %c0_i32, %c0_i32_0 : i32, i32
  }
  func.func @transform_9(%arg0: i32) -> (i32, i32) {
    %c0_i32 = arith.constant 0 : i32
    %c0_i32_0 = arith.constant 0 : i32
    %c0_i32_1 = arith.constant 0 : i32
    return %c0_i32, %c0_i32_0 : i32, i32
  }
  func.func @transform_10(%arg0: i32) -> (i32, i32) {
    %c0_i32 = arith.constant 0 : i32
    %c0_i32_0 = arith.constant 0 : i32
    %c0_i32_1 = arith.constant 0 : i32
    return %c0_i32, %c0_i32_0 : i32, i32
  }
  func.func @transform_11(%arg0: i32) -> (i32, i32, i32) {
    %c0_i32 = arith.constant 0 : i32
    %c0_i32_0 = arith.constant 0 : i32
    %c0_i32_1 = arith.constant 0 : i32
    return %arg0, %c0_i32, %c0_i32_0 : i32, i32, i32
  }
}

</mosaic_0001>

<bundles_post_ra>
// kernel: decoder_decode.1
= control target key start
LH: loop header
LB: loop body
LE: loop exit
PB: predicated region body
PF: predicated region fallthrough
CT: control target
= control target key end

     0   :  { %v806_v0 = vmov 0.0|0.0   ;;  %vm807_vm0 = vmmov 0   ;;  %v808_v4 = vmov 0.0   ;;  %vm43_vm1 = vcmask 516096   ;;  %s809_s14 = smov 64   ;;  %s1177_s1 = inlined_call_operand.vmem [shape: f32[128,8], index: 1, kind: input, shape index: {}]   ;;  %s1178_s2 = inlined_call_operand.vmem [shape: f32[1,64], index: 2, kind: input, shape index: {}]   ;;  %s1179_s4 = inlined_call_operand.vmem [shape: f32[1,64], index: 4, kind: input, shape index: {}]   ;;  %s1180_s3 = inlined_call_operand.vmem [shape: f32[1,128], index: 3, kind: input, shape index: {}]   ;;  %s1181_s0 = inlined_call_operand.vmem [shape: f32[8,128], index: 0, kind: input, shape index: {}]   ;;  %s1182_s5 = inlined_call_operand.vmem [shape: f32[128,192], index: 5, kind: input, shape index: {}]   ;;  %s1183_s7 = inlined_call_operand.vmem [shape: f32[64,192], index: 7, kind: input, shape index: {}]   ;;  %s1184_s8 = inlined_call_operand.vmem [shape: f32[1,192], index: 8, kind: input, shape index: {}]   ;;  %s1185_s6 = inlined_call_operand.vmem [shape: f32[1,192], index: 6, kind: input, shape index: {}]   ;;  %s1186_s9 = inlined_call_operand.vmem [shape: f32[64,256], index: 9, kind: input, shape index: {}]   ;;  %s1187_s10 = inlined_call_operand.vmem [shape: f32[1,256], index: 10, kind: input, shape index: {}]   ;;  %s1188_s11 = inlined_call_operand.vmem [shape: f32[1,1,384], index: 11, kind: output, shape index: {}]  }
   0x1   :  { %697 = vmatprep.subr.bf16.mxu0 %v806_v0  ;;  %v48_v1 = vld [vmem:[%s1177_s1] sm:$0xff]  ;;  %v49_v2 = vld [vmem:[%s1177_s1 + $0x8] sm:$0xff]  ;;  %v50_v3 = vld [vmem:[%s1177_s1 + $0x10] sm:$0xff]  ;;  %689 = vmatprep.mubr.msk.f32.mxu0 %vm807_vm0, %v808_v4  ;;  %vm140_vm2 = vcmask 57344   ;;  %vm152_vm3 = vcmask 64512   ;;  %vm370_vm4 = vcmask 523264  }
   0x2   :  { %v698_v5 = vpack.c.bf16 %v49_v2, %v48_v1  ;;  %v51_v6 = vld [vmem:[%s1177_s1 + $0x18] sm:$0xff]  ;;  %692 = vmatprep.subr.mxu1 %v808_v4  ;;  %694 = vmatprep.mubr.msk.f32.mxu1 %vm807_vm0, %v808_v4  ;;  %v52_v8 = vld [vmem:[%s1177_s1 + $0x20] sm:$0xff]  ;;  %v53_v9 = vld [vmem:[%s1177_s1 + $0x28] sm:$0xff]  ;;  %vm576_vm5 = vcmask 1040384  }
   0x3   :  { %v701_v7 = vpack.c.bf16 %v51_v6, %v50_v3  ;;  %v42_v10 = vld [vmem:[%s1178_s2] sm:$0x1]  ;;  %v704_v11 = vpack.c.bf16 %v53_v9, %v52_v8  ;;  %v54_v12 = vld [vmem:[%s1177_s1 + $0x30] sm:$0xff]  ;;  %v55_v13 = vld [vmem:[%s1177_s1 + $0x38] sm:$0xff] }
   0x4   :  { %699 = vmatpush3.bf16.msra.mxu0 %v698_v5  ;;  %44 = vst.msk [vmem:[#allocation2] sm:$0x1] %vm43_vm1, %v42_v10  ;;  %v707_v14 = vpack.c.bf16 %v55_v13, %v54_v12  ;;  %v64_v15 = vld [vmem:[%s1179_s4] sm:$0x1]  ;;  %v57_v17 = vld [vmem:[%s1177_s1 + $0x48] sm:$0xff]  ;;  %v58_v21 = vld [vmem:[%s1177_s1 + $0x50] sm:$0xff] }
   0x5   :  { %700 = vmatprep.subr.bf16.mxu0 %v806_v0  ;;  %v56_v16 = vld [vmem:[%s1177_s1 + $0x40] sm:$0xff]  ;;  %v59_v22 = vld [vmem:[%s1177_s1 + $0x58] sm:$0xff]  ;;  %v61_v26 = vld [vmem:[%s1177_s1 + $0x68] sm:$0xff] }
   0x6   :  { %v710_v20 = vpack.c.bf16 %v57_v17, %v56_v16  ;;  %v713_v24 = vpack.c.bf16 %v59_v22, %v58_v21  ;;  %v60_v25 = vld [vmem:[%s1177_s1 + $0x60] sm:$0xff]  ;;  %v62_v28 = vld [vmem:[%s1177_s1 + $0x70] sm:$0xff]  ;;  %v63_v29 = vld [vmem:[%s1177_s1 + $0x78] sm:$0xff] }
   0x7   :  { %v716_v27 = vpack.c.bf16 %v61_v26, %v60_v25  ;;  %v719_v30 = vpack.c.bf16 %v63_v29, %v62_v28  ;;  %v47_v31 = vld [vmem:[%s1180_s3] sm:$0x1]  ;;  %v228_v43 = vld [vmem:[%s1182_s5 + $0x8] sm:$0xff]  ;;  %v230_v44 = vld [vmem:[%s1182_s5 + $0x18] sm:$0xff] }
   0x8   :  { %702 = vmatpush3.bf16.msra.mxu0 %v701_v7  ;;  %v46_v42 = vld [vmem:[%s1181_s0] sm:$0xff]  ;;  %v721_v45 = vpack.c.bf16 %v230_v44, %v228_v43  ;;  %v343_v46 = vld [vmem:[%s1183_s7 + $0x8] sm:$0xff]  ;;  %v345_v47 = vld [vmem:[%s1183_s7 + $0x18] sm:$0xff] }
   0x9   :  { %703 = vmatprep.subr.bf16.mxu0 %v806_v0  ;;  %693 = vmatpush3.msra.mxu1 %v46_v42  ;;  %v342_v48 = vld [vmem:[%s1183_s7] sm:$0xff]  ;;  %v753_v49 = vpack.c.bf16 %v345_v47, %v343_v46  ;;  %v344_v50 = vld [vmem:[%s1183_s7 + $0x10] sm:$0xff]  ;;  %v347_v52 = vld [vmem:[%s1183_s7 + $0x28] sm:$0xff] }
   0xa   :  { %722 = vmatprep.subr.bf16.mxu1 %v721_v45  ;;  %v755_v51 = vpack.c.bf16 %v344_v50, %v342_v48  ;;  %v349_v53 = vld [vmem:[%s1183_s7 + $0x38] sm:$0xff]  ;;  %v346_v55 = vld [vmem:[%s1183_s7 + $0x20] sm:$0xff]  ;;  %v348_v56 = vld [vmem:[%s1183_s7 + $0x30] sm:$0xff] }
   0xb   :  { %v911_v18 = vld [vmem:[#allocation2] sm:$0x1]  ;;  %v757_v54 = vpack.c.bf16 %v349_v53, %v347_v52  ;;  %v759_v57 = vpack.c.bf16 %v348_v56, %v346_v55  ;;  %v351_v58 = vld [vmem:[%s1183_s7 + $0x48] sm:$0xff]  ;;  %v353_v59 = vld [vmem:[%s1183_s7 + $0x58] sm:$0xff]  ;;  %v261_v56 = vlaneseq }
   0xc   :  { %705 = vmatpush3.bf16.msra.mxu0 %v704_v11  ;;  %v65_v19 = vmul.f32 %v64_v15, %v911_v18  ;;  %v761_v60 = vpack.c.bf16 %v353_v59, %v351_v58  ;;  %v350_v61 = vld [vmem:[%s1183_s7 + $0x40] sm:$0xff]  ;;  %v352_v62 = vld [vmem:[%s1183_s7 + $0x50] sm:$0xff]  ;;  %v357_v1 = vld [vmem:[%s1183_s7 + $0x78] sm:$0xff] }
   0xd   :  { %706 = vmatprep.subr.bf16.mxu0 %v806_v0  ;;  %v763_v63 = vpack.c.bf16 %v352_v62, %v350_v61  ;;  %v354_v3 = vld [vmem:[%s1183_s7 + $0x60] sm:$0xff]  ;;  %v356_v5 = vld [vmem:[%s1183_s7 + $0x70] sm:$0xff]  ;;  %v232_v10 = vld [vmem:[%s1182_s5 + $0x28] sm:$0xff]  ;;  %vm627_vm6 = vcmp.lt.s32.totalorder %v261_v56, 384 }
   0xe   :  { %v67_v23 = vsel %vm43_vm1, %v65_v19, 0.0  ;;  %v767_v6 = vpack.c.bf16 %v356_v5, %v354_v3  ;;  %v227_v8 = vld [vmem:[%s1182_s5] sm:$0xff]  ;;  %v229_v9 = vld [vmem:[%s1182_s5 + $0x10] sm:$0xff]  ;;  %v234_v11 = vld [vmem:[%s1182_s5 + $0x38] sm:$0xff] }
   0xf   :  { %68 = vadd.xlane.f32.xlu0 %v67_v23  ;;  %v723_v13 = vpack.c.bf16 %v229_v9, %v227_v8  ;;  %v725_v15 = vpack.c.bf16 %v234_v11, %v232_v10  ;;  %v231_v16 = vld [vmem:[%s1182_s5 + $0x20] sm:$0xff]  ;;  %v233_v17 = vld [vmem:[%s1182_s5 + $0x30] sm:$0xff]  ;;  %v236_v19 = vld [vmem:[%s1182_s5 + $0x48] sm:$0xff] }
  0x10   :  { %708 = vmatpush3.bf16.msra.mxu0 %v707_v14  ;;  %v727_v21 = vpack.c.bf16 %v233_v17, %v231_v16  ;;  %v235_v23 = vld [vmem:[%s1182_s5 + $0x40] sm:$0xff]  ;;  %v240_v25 = vld [vmem:[%s1182_s5 + $0x68] sm:$0xff]  ;;  %v242_v26 = vld [vmem:[%s1182_s5 + $0x78] sm:$0xff] }
  0x11   :  { %709 = vmatprep.subr.bf16.mxu0 %v806_v0  ;;  %v733_v28 = vpack.c.bf16 %v242_v26, %v240_v25  ;;  %v239_v29 = vld [vmem:[%s1182_s5 + $0x60] sm:$0xff]  ;;  %v249_v42 = vld [vmem:[%s1182_s5 + $0xb0] sm:$0xff]  ;;  %v252_v43 = vld [vmem:[%s1182_s5 + $0xc8] sm:$0xff] }
  0x12   :  { %v254_v44 = vld [vmem:[%s1182_s5 + $0xd8] sm:$0xff]  ;;  %v251_v47 = vld [vmem:[%s1182_s5 + $0xc0] sm:$0xff]  ;;  %v253_v48 = vld [vmem:[%s1182_s5 + $0xd0] sm:$0xff] }
  0x13   :  { %v745_v46 = vpack.c.bf16 %v254_v44, %v252_v43  ;;  %v258_v50 = vld [vmem:[%s1182_s5 + $0xf8] sm:$0xff]  ;;  %v255_v53 = vld [vmem:[%s1182_s5 + $0xe0] sm:$0xff]  ;;  %v477_v25 = vld [vmem:[%s1186_s9 + $0x10] sm:$0xff] }
  0x14   :  { %711 = vmatpush3.bf16.msra.mxu0 %v710_v20  ;;  %v238_v20 = vld [vmem:[%s1182_s5 + $0x58] sm:$0xff]  ;;  %v480_v26 = vld [vmem:[%s1186_s9 + $0x28] sm:$0xff]  ;;  %v487_v43 = vld [vmem:[%s1186_s9 + $0x60] sm:$0xff] }
  0x15   :  { %712 = vmatprep.subr.bf16.mxu0 %v806_v0  ;;  %v729_v22 = vpack.c.bf16 %v238_v20, %v236_v19  ;;  %v489_v44 = vld [vmem:[%s1186_s9 + $0x70] sm:$0xff] }
  0x18   :  { %714 = vmatpush3.bf16.msra.mxu0 %v713_v24  ;;  %v237_v24 = vld [vmem:[%s1182_s5 + $0x50] sm:$0xff] }
  0x19   :  { %715 = vmatprep.subr.bf16.mxu0 %v806_v0 }
  0x1c   :  { %717 = vmatpush3.bf16.msra.mxu0 %v716_v27  ;;  %v731_v27 = vpack.c.bf16 %v237_v24, %v235_v23  ;;  %v475_v23 = vld [vmem:[%s1186_s9] sm:$0xff] }
  0x1d   :  { %718 = vmatprep.subr.bf16.mxu0 %v806_v0  ;;  %v355_v0 = vld [vmem:[%s1183_s7 + $0x68] sm:$0xff] }
  0x1e   :  { %v765_v2 = vpack.c.bf16 %v357_v1, %v355_v0  ;;  %v358_v1 = vld [vmem:[%s1184_s8] sm:$0x3] }
  0x20   :  { %720 = vmatpush3.bf16.msra.mxu0 %v719_v30  ;;  %v241_v30 = vld [vmem:[%s1182_s5 + $0x70] sm:$0xff] }
  0x21   :  { %754 = vmatprep.subr.bf16.mxu0 %v753_v49  ;;  %v256_v49 = vld [vmem:[%s1182_s5 + $0xe8] sm:$0xff] }
  0x22   :  { %v749_v52 = vpack.c.bf16 %v258_v50, %v256_v49 }
  0x23   :  { %690 = vmatmul.mubr.f32.vlgmr.msra.gmra.mrb[0].mxu0 %v47_v31  ;;  %v244_v31 = vld [vmem:[%s1182_s5 + $0x88] sm:$0xff] }
  0x24   :  { %438 = vmatprep.mubr.f32.mxu0 %v808_v4  ;;  %756 = vmatpush1.bf16.msra.mxu0 %v755_v51  ;;  %v747_v51 = vpack.c.bf16 %v253_v48, %v251_v47 }
  0x25   :  { %758 = vmatprep.subr.bf16.mxu0 %v757_v54  ;;  %v257_v54 = vld [vmem:[%s1182_s5 + $0xf0] sm:$0xff] }
  0x26   :  { %v751_v55 = vpack.c.bf16 %v257_v54, %v255_v53  ;;  %v491_v53 = vld [vmem:[%s1187_s10] sm:$0x3] }
  0x28   :  { %760 = vmatpush1.bf16.msra.mxu0 %v759_v57  ;;  %v1088_v57 = vshrl.u32 %v261_v56, 7 }
  0x29   :  { %762 = vmatprep.subr.bf16.mxu0 %v761_v60 }
  0x2a   :  { %v1091_v58 = vsub.s32 0, %v1088_v57 }
  0x2c   :  { %764 = vmatpush1.bf16.msra.mxu0 %v763_v63  ;;  %v464_v59 = vrot.slane %v911_v18, %v1091_v58  ;;  %v496_v54 = vrot.slane %v491_v53, %v1091_v58 }
  0x2d   :  { %766 = vmatprep.subr.bf16.mxu0 %v765_v2  ;;  %v259_v2 = vld [vmem:[%s1185_s6] sm:$0x3] }
  0x2e   :  { %v264_v3 = vrot.slane %v259_v2, %v1091_v58 }
  0x30   :  { %768 = vmatpush1.bf16.msra.mxu0 %v767_v6 }
  0x33   :  { %635 = vmatmul.mubr.msk.f32.vlgmr.msra.gmra.mrb[2].mxu0 %vm370_vm4, %v911_v18  ;;  %v363_v18 = vrot.slane %v358_v1, %v1091_v58 }
  0x9c   :  { %v69_v32 = vpop.xlane.xlu0 %68 }
  0xf6   :  { %v136_v33 = vpop.f32.mrb[0].mxu0 }
  0xf7   :  { %v137_v34 = vadd.f32 %v136_v33, %v69_v32  ;;  %v691_v35 = vpop.f32.mrb[1].mxu0  ;;  %v246_v32 = vld [vmem:[%s1182_s5 + $0x98] sm:$0xff]  ;;  %v735_v33 = vpack.c.bf16 %v241_v30, %v239_v29  ;;  %v479_v30 = vld [vmem:[%s1186_s9 + $0x20] sm:$0xff] }
  0xf8   :  { %v243_v35 = vld [vmem:[%s1182_s5 + $0x80] sm:$0xff] }
  0xf9   :  { %v141_v36 = vsel %vm140_vm2, %v137_v34, -inf }
  0xfa   :  { %142 = vmax.xlane.f32.xlu0 %v141_v36  ;;  %v245_v36 = vld [vmem:[%s1182_s5 + $0x90] sm:$0xff] }
 0x106   :  { %v440_v63 = vpop.f32.mrb[2].mxu0 }
 0x107   :  { %v442_v0 = vpop.f32.mrb[3].mxu0  ;;  %v441_v5 = vadd.f32 %v440_v63, %v363_v18 }
 0x110   :  { %465 = vrot.lane.b32.xlu0 %v464_v59, %s809_s14 }
 0x187   :  { %v143_v37 = vpop.xlane.xlu0 %142 }
 0x188   :  { %v144_v38 = vsub.f32 %v137_v34, %v143_v37  ;;  %v737_v34 = vpack.c.bf16 %v246_v32, %v244_v31  ;;  %v248_v37 = vld [vmem:[%s1182_s5 + $0xa8] sm:$0xff]  ;;  %v481_v31 = vld [vmem:[%s1186_s9 + $0x30] sm:$0xff] }
 0x189   :  { %v484_v32 = vld [vmem:[%s1186_s9 + $0x48] sm:$0xff] }
 0x18a   :  { %v145_v39 = vmul.f32 1.442695, %v144_v38  ;;  %v250_v38 = vld [vmem:[%s1182_s5 + $0xb8] sm:$0xff] }
 0x18c   :  { %790 = vpow2.f32 %v145_v39  ;;  %v739_v39 = vpack.c.bf16 %v245_v36, %v243_v35  ;;  %v483_v36 = vld [vmem:[%s1186_s9 + $0x40] sm:$0xff] }
 0x196   :  { %v791_v40 = vpop.eup %790 }
 0x197   :  { %v147_v41 = vsel %vm140_vm2, %v791_v40, 0.0 }
 0x198   :  { %148 = vadd.xlane.f32.xlu1 %v147_v41  ;;  %v247_v41 = vld [vmem:[%s1182_s5 + $0xa0] sm:$0xff] }
 0x199   :  { %v743_v45 = vpack.c.bf16 %v249_v42, %v247_v41 }
 0x225   :  { %v149_v7 = vpop.xlane.xlu1 %148 }
 0x226   :  { %792 = vrcp.f32 %v149_v7 }
 0x230   :  { %v793_v12 = vpop.eup %792 }
 0x231   :  { %v151_v14 = vmul.f32 %v793_v12, %v791_v40  ;;  %v741_v40 = vpack.c.bf16 %v250_v38, %v248_v37  ;;  %v1106_v12 = vsub.s32 1, %v1088_v57  ;;  %v485_v37 = vld [vmem:[%s1186_s9 + $0x50] sm:$0xff]  ;;  %v488_v38 = vld [vmem:[%s1186_s9 + $0x68] sm:$0xff] }
 0x232   :  { %v779_v41 = vpack.c.bf16 %v485_v37, %v483_v36 }
 0x233   :  { %695 = vmatmul.mubr.msk.f32.vlgmr.msra.gmra.mrb[0].mxu1 %vm152_vm3, %v151_v14  ;;  %v268_v14 = vrot.slane %v259_v2, %v1106_v12 }
 0x234   :  { %724 = vmatpush1.bf16.msra.mxu1 %v723_v13  ;;  %335 = vmatprep.mubr.f32.mxu1 %v808_v4  ;;  %v367_v13 = vrot.slane %v358_v1, %v1106_v12 }
 0x235   :  { %726 = vmatprep.subr.bf16.mxu1 %v725_v15 }
 0x236   :  { %v443_v15 = vadd.f32 %v442_v0, %v367_v13 }
 0x238   :  { %728 = vmatpush1.bf16.msra.mxu1 %v727_v21  ;;  %v476_v21 = vld [vmem:[%s1186_s9 + $0x8] sm:$0xff] }
 0x239   :  { %730 = vmatprep.subr.bf16.mxu1 %v729_v22  ;;  %v478_v22 = vld [vmem:[%s1186_s9 + $0x18] sm:$0xff] }
 0x23a   :  { %v769_v24 = vpack.c.bf16 %v478_v22, %v476_v21 }
 0x23c   :  { %732 = vmatpush1.bf16.msra.mxu1 %v731_v27  ;;  %v482_v27 = vld [vmem:[%s1186_s9 + $0x38] sm:$0xff] }
 0x23d   :  { %734 = vmatprep.subr.bf16.mxu1 %v733_v28  ;;  %v771_v28 = vpack.c.bf16 %v477_v25, %v475_v23  ;;  %v773_v29 = vpack.c.bf16 %v482_v27, %v480_v26 }
 0x240   :  { %736 = vmatpush1.bf16.msra.mxu1 %v735_v33  ;;  %v486_v33 = vld [vmem:[%s1186_s9 + $0x58] sm:$0xff] }
 0x241   :  { %738 = vmatprep.subr.bf16.mxu1 %v737_v34  ;;  %v775_v34 = vpack.c.bf16 %v481_v31, %v479_v30  ;;  %v777_v35 = vpack.c.bf16 %v486_v33, %v484_v32 }
 0x244   :  { %740 = vmatpush1.bf16.msra.mxu1 %v739_v39  ;;  %v490_v39 = vld [vmem:[%s1186_s9 + $0x78] sm:$0xff] }
 0x245   :  { %742 = vmatprep.subr.bf16.mxu1 %v741_v40  ;;  %v781_v42 = vpack.c.bf16 %v490_v39, %v488_v38 }
 0x248   :  { %744 = vmatpush1.bf16.msra.mxu1 %v743_v45  ;;  %v783_v45 = vpack.c.bf16 %v489_v44, %v487_v43 }
 0x249   :  { %746 = vmatprep.subr.bf16.mxu1 %v745_v46  ;;  %v466_v46 = vpop.permute.xlu0 %465 }
 0x24c   :  { %748 = vmatpush1.bf16.msra.mxu1 %v747_v51 }
 0x24d   :  { %750 = vmatprep.subr.bf16.mxu1 %v749_v52 }
 0x250   :  { %752 = vmatpush1.bf16.msra.mxu1 %v751_v55  ;;  %v500_v55 = vrot.slane %v491_v53, %v1106_v12 }
 0x251   :  { %770 = vmatprep.subr.bf16.mxu1 %v769_v24 }
 0x306   :  { %v222_v60 = vpop.f32.mrb[0].mxu1 }
 0x307   :  { %v226_v61 = vmax.f32 %v222_v60, 0.0  ;;  %v696_v62 = vpop.f32.mrb[1].mxu1 }
 0x309   :  { %336 = vmatmul.mubr.f32.vlgmr.msra.gmra.mrb[2].mxu1 %v226_v61 }
 0x30a   :  { %569 = vmatprep.mubr.f32.mxu1 %v808_v4  ;;  %772 = vmatpush1.bf16.msra.mxu1 %v771_v28 }
 0x30b   :  { %774 = vmatprep.subr.bf16.mxu1 %v773_v29 }
 0x30e   :  { %776 = vmatpush1.bf16.msra.mxu1 %v775_v34 }
 0x30f   :  { %778 = vmatprep.subr.bf16.mxu1 %v777_v35 }
 0x312   :  { %780 = vmatpush1.bf16.msra.mxu1 %v779_v41 }
 0x313   :  { %782 = vmatprep.subr.bf16.mxu1 %v781_v42 }
 0x316   :  { %784 = vmatpush1.bf16.msra.mxu1 %v783_v45 }
 0x3dc   :  { %v337_v6 = vpop.f32.mrb[2].mxu1 }
 0x3dd   :  { %v338_v7 = vadd.f32 %v337_v6, %v264_v3  ;;  %v339_v8 = vpop.f32.mrb[3].mxu1 }
 0x3de   :  { %v340_v19 = vadd.f32 %v339_v8, %v268_v14 }
 0x3df   :  { %v445_v9 = vadd.f32 %v441_v5, %v338_v7 }
 0x3e1   :  { %v636_v4 = vmul.f32 -1.442695, %v445_v9 }
 0x3e3   :  { %794 = vpow2.f32 %v636_v4 }
 0x3ed   :  { %v795_v10 = vpop.eup %794 }
 0x3ee   :  { %v449_v11 = vadd.f32 1.0, %v795_v10 }
 0x3f0   :  { %796 = vrcp.f32 %v449_v11  ;;  %v810_v11 = vmov 1966171168  }
 0x3f1   :  { %v603_v12 = vunpack.c.l.s4 %v810_v11 }
 0x3f3   :  { %v604_v13 = vunpack.c.0.s8 %v603_v12 }
 0x3fa   :  { %v797_v16 = vpop.eup %796 }
 0x3fb   :  { %v452_v17 = vmul.f32 %v797_v16, %v443_v15  ;;  %v455_v47 = vsub.f32 1.0, %v797_v16  ;;  %v468_v49 = vmul.f32 %v797_v16, %v466_v46  ;;  %v607_v16 = vsub.s32 %v604_v13, %v1088_v57 }
 0x3fd   :  { %v453_v20 = vadd.f32 %v452_v17, %v340_v19 }
 0x3ff   :  { %798 = vtanh.f32 %v453_v20 }
 0x409   :  { %v799_v40 = vpop.eup %798 }
 0x40a   :  { %457 = vrot.lane.b32.xlu1 %v799_v40, %s809_s14 }
 0x47c   :  { %v458_v48 = vpop.permute.xlu1 %457 }
 0x47d   :  { %v460_v50 = vmul.f32 %v458_v48, %v455_v47 }
 0x47f   :  { %v469_v51 = vadd.f32 %v468_v49, %v460_v50 }
 0x481   :  { %471 = vrot.lane.b32.xlu1 %v469_v51, %s809_s14 }
 0x4f3   :  { %v472_v52 = vpop.permute.xlu1 %471 }
 0x4f4   :  { %474 = vst.msk [vmem:[#allocation2] sm:$0x1] %vm43_vm1, %v472_v52  ;;  %637 = vmatmul.mubr.msk.f32.vlgmr.msra.gmra.mrb[4].mxu1 %vm370_vm4, %v472_v52  ;;  %v597_v20 = vsel %vm370_vm4, %v472_v52, 0.0 }
 0x4f5   :  { %v615_v22 = vrot.slane %v597_v20, %v607_v16 }
 0x5c7   :  { %v571_v59 = vpop.f32.mrb[4].mxu1 }
 0x5c8   :  { %v572_v60 = vadd.f32 %v571_v59, %v496_v54  ;;  %v573_v61 = vpop.f32.mrb[5].mxu1 }
 0x5c9   :  { %v574_v62 = vadd.f32 %v573_v61, %v500_v55 }
 0x5ca   :  { %v577_v63 = vsel %vm576_vm5, %v572_v60, -inf }
 0x5cb   :  { %v578_v0 = vsel %vm576_vm5, %v574_v62, -inf }
 0x5cc   :  { %v579_v1 = vmax.f32 %v577_v63, %v578_v0 }
 0x5ce   :  { %580 = vmax.xlane.f32.xlu1 %v579_v1 }
 0x65b   :  { %v581_v2 = vpop.xlane.xlu1 %580 }
 0x65c   :  { %v582_v18 = vsub.f32 %v572_v60, %v581_v2  ;;  %v583_v3 = vsub.f32 %v574_v62, %v581_v2 }
 0x65e   :  { %v584_v5 = vmul.f32 1.442695, %v582_v18  ;;  %v586_v6 = vmul.f32 1.442695, %v583_v3 }
 0x660   :  { %800 = vpow2.f32 %v584_v5 }
 0x661   :  { %802 = vpow2.f32 %v586_v6 }
 0x66a   :  { %v801_v58 = vpop.eup %800 }
 0x66b   :  { %v803_v7 = vpop.eup %802  ;;  %v588_v8 = vsel %vm576_vm5, %v801_v58, 0.0 }
 0x66c   :  { %v589_v9 = vsel %vm576_vm5, %v803_v7, 0.0 }
 0x66d   :  { %v590_v4 = vadd.f32 %v589_v9, %v588_v8 }
 0x66f   :  { %591 = vadd.xlane.f32.xlu0 %v590_v4 }
 0x6fc   :  { %v592_v10 = vpop.xlane.xlu0 %591 }
 0x6fd   :  { %804 = vlog2.f32 %v592_v10 }
 0x707   :  { %v805_v14 = vpop.eup %804 }
 0x708   :  { %v594_v15 = vmul.f32 0.6931472, %v805_v14 }
 0x70a   :  { %v595_v17 = vsub.f32 %v582_v18, %v594_v15  ;;  %v596_v19 = vsub.f32 %v583_v3, %v594_v15 }
 0x70c   :  { %v601_v21 = vcombine.low %v595_v17, %v596_v19 }
 0x70e   :  { %v608_v23 = vrot.slane %v601_v21, %v607_v16 }
 0x710   :  { %v616_v24 = vcombine.low %v608_v23, %v615_v22 }
 0x712   :  { %v623_v25 = vrot.slane %v616_v24, %v607_v16 }
 0x714   :  { %629 = vst.msk [vmem:[%s1188_s11] sm:$0x7] %vm627_vm6, %v623_v25 }

</bundles_post_ra>
